<compile_context>
chip_gen: v5e
topology: v5e:2x2
jax: 0.10.0
libtpu: 0.0.40
codegen_flags: <defaults>
</compile_context>

<pallas_src>
import jax
import jax.numpy as jnp
from jax.experimental import pallas as pl
from jax.experimental.pallas import tpu as pltpu

# ~8 MiB per-array tiles: 3 arrays x 2 buffers = 48 MiB double-buffered
# footprint, inside the 52 MiB scoped-VMEM limit we request below and within
# v7x's 64 MiB-per-TensorCore physical VMEM.
_TILE_BYTES = 8 << 20
_VMEM_LIMIT_BYTES = 52 << 20
_MIN_PALLAS_ELEMENTS = 1 << 20  # below this, plain fused XLA wins (latency-bound)
_LANE_WIDTHS = (512, 256, 128)  # widest lane-dense layout that divides `total`


def _abs_add_kernel(x_ref, y_ref, o_ref):
    # Pure VPU elementwise blend on one (TM, C) VMEM tile.
    o_ref[...] = jnp.abs(x_ref[...]) + jnp.abs(y_ref[...])


def naive_add(x: jax.Array, y: jax.Array, *,
              min_pallas_elements: int = _MIN_PALLAS_ELEMENTS) -> jax.Array:
    """out = |x| + |y|, computed in a tiled Pallas TPU kernel."""
    assert x.shape == y.shape and x.dtype == y.dtype
    orig_shape = x.shape
    total = x.size
    itemsize = jnp.dtype(x.dtype).itemsize

    # Lane width: widest of {512, 256, 128} that divides the element count, so
    # the flatten/reshape around the kernel are zero-copy (no jnp.pad, no slice).
    C = next((c for c in _LANE_WIDTHS if total % c == 0), None)

    # Fallbacks: tiny inputs (kernel launch/DMA-setup overhead dominates) or
    # lane-ragged sizes (would need a padding copy that doubles HBM traffic).
    if C is None or total < max(min_pallas_elements, 1):
        return jnp.abs(x) + jnp.abs(y)

    rows = total // C

    # Row-tile: dtype-scaled so tile bytes stay ~_TILE_BYTES, rounded to the
    # sublane packing (8 rows f32, 16 bf16, 32 int8). If the whole slab is
    # smaller than one tile, use the full extent (always a legal block shape).
    sublane = max(8 * 4 // itemsize, 8)
    tm_target = max((_TILE_BYTES // (C * itemsize)) // sublane * sublane, sublane)
    TM = rows if rows <= tm_target else tm_target

    x2d = jnp.ravel(x).reshape(rows, C)   # free reshapes (contiguous input)
    y2d = jnp.ravel(y).reshape(rows, C)

    grid = (pl.cdiv(rows, TM),)           # ragged last block masked by Pallas

    out2d = pl.pallas_call(
        _abs_add_kernel,
        out_shape=jax.ShapeDtypeStruct((rows, C), x.dtype),
        grid=grid,
        in_specs=[
            pl.BlockSpec((TM, C), lambda i: (i, 0)),   # x tile
            pl.BlockSpec((TM, C), lambda i: (i, 0)),   # y tile
        ],
        out_specs=pl.BlockSpec((TM, C), lambda i: (i, 0)),
        compiler_params=pltpu.CompilerParams(
            # Independent tiles: shard across TensorCores where available.
            # TODO(synk): verify 2-TC sharding on v7x in xprof; switch to
            # pltpu.CORE_PARALLEL / pl.core_map if a single core is used.
            dimension_semantics=("parallel",),
            # Raise the scoped-VMEM limit above the ~16 MiB v5e default so the
            # 48 MiB double-buffered footprint compiles on every generation,
            # while staying under v7x's 64 MiB-per-TC physical VMEM.
            vmem_limit_bytes=_VMEM_LIMIT_BYTES,
        ),
        cost_estimate=pl.CostEstimate(
            flops=3 * total,                      # 2x abs + 1x add per element
            transcendentals=0,
            bytes_accessed=3 * total * itemsize,  # 2 reads + 1 write
        ),
    )(x2d, y2d)

    return out2d.reshape(orig_shape)


if __name__ == "__main__":
    key = jax.random.PRNGKey(0)
    k1, k2 = jax.random.split(key)

    # NCHW inputs, small shapes: batch=2, channels=4, spatial=16x16.
    x = jax.random.normal(k1, (2, 4, 16, 16), dtype=jnp.float32)
    y = jax.random.normal(k2, (2, 4, 16, 16), dtype=jnp.float32)

    # Reference in plain JAX (matches torch.abs(x) + torch.abs(y)).
    ref = jnp.abs(x) + jnp.abs(y)

    # Force the Pallas path so the kernel itself is exercised even at this
    # small demo size.
    out_kernel = naive_add(x, y, min_pallas_elements=0)
    jax.block_until_ready(out_kernel)
    assert out_kernel.shape == x.shape
    assert out_kernel.dtype == x.dtype
    assert jnp.allclose(out_kernel, ref, atol=1e-6, rtol=1e-6)

    # Default behaviour: small inputs take the fused-XLA fast path.
    out_default = naive_add(x, y)
    jax.block_until_ready(out_default)
    assert jnp.allclose(out_default, ref, atol=1e-6, rtol=1e-6)

    print("KERNEL_OK")
</pallas_src>

<mosaic_0001>
module attributes {stable_mosaic.version = 11 : i64} {
  func.func @_abs_add_kernel(%arg0: i32, %arg1: memref<4x512xf32, #tpu.memory_space<vmem>>, %arg2: memref<4x512xf32, #tpu.memory_space<vmem>>, %arg3: memref<4x512xf32, #tpu.memory_space<vmem>>) attributes {dimension_semantics = [#tpu.dimension_semantics<parallel>], iteration_bounds = array<i64: 1>, scalar_prefetch = 0 : i64, scratch_operands = 0 : i64, tpu.core_type = #tpu.core_type<tc>, window_params = [{transform_indices = @transform_0, window_bounds = array<i64: 4, 512>}, {transform_indices = @transform_1, window_bounds = array<i64: 4, 512>}, {transform_indices = @transform_2, window_bounds = array<i64: 4, 512>}]} {
    %c0 = arith.constant 0 : index
    %c0_0 = arith.constant 0 : index
    %0 = vector.load %arg1[%c0, %c0_0] : memref<4x512xf32, #tpu.memory_space<vmem>>, vector<4x512xf32>
    %1 = math.absf %0 : vector<4x512xf32>
    %c0_1 = arith.constant 0 : index
    %c0_2 = arith.constant 0 : index
    %2 = vector.load %arg2[%c0_1, %c0_2] : memref<4x512xf32, #tpu.memory_space<vmem>>, vector<4x512xf32>
    %3 = math.absf %2 : vector<4x512xf32>
    %4 = arith.addf %1, %3 : vector<4x512xf32>
    %c0_3 = arith.constant 0 : index
    %c0_4 = arith.constant 0 : index
    %5 = vector.load %arg3[%c0_3, %c0_4] : memref<4x512xf32, #tpu.memory_space<vmem>>, vector<4x512xf32>
    tpu.vector_store %arg3[%c0_3, %c0_4], %4 {strides = array<i32>} : memref<4x512xf32, #tpu.memory_space<vmem>>, vector<4x512xf32>,
    return
  }
  func.func @transform_0(%arg0: i32) -> (i32, i32) {
    %c0_i32 = arith.constant 0 : i32
    %c0_i32_0 = arith.constant 0 : i32
    return %arg0, %c0_i32 : i32, i32
  }
  func.func @transform_1(%arg0: i32) -> (i32, i32) {
    %c0_i32 = arith.constant 0 : i32
    %c0_i32_0 = arith.constant 0 : i32
    return %arg0, %c0_i32 : i32, i32
  }
  func.func @transform_2(%arg0: i32) -> (i32, i32) {
    %c0_i32 = arith.constant 0 : i32
    %c0_i32_0 = arith.constant 0 : i32
    return %arg0, %c0_i32 : i32, i32
  }
}

</mosaic_0001>

<bundles_post_ra>
// kernel: tpu_custom_call.1
= control target key start
LH: loop header
LB: loop body
LE: loop exit
PB: predicated region body
PF: predicated region fallthrough
CT: control target
= control target key end

     0   :  { %7 = vsyncpa [#allocation3], 0  ;;  %s178_s0 = inlined_call_operand.hbm [shape: f32[4,512], index: 0, kind: input, shape index: {}]   ;;  %s179_s1 = inlined_call_operand.hbm [shape: f32[4,512], index: 1, kind: input, shape index: {}]   ;;  %s180_s2 = inlined_call_operand.hbm [shape: f32[4,512], index: 2, kind: output, shape index: {}]  }
   0x1   :  { %8 = vsyncpa [#allocation6], 0 }
   0x2   :  { %9 = vsyncpa [#allocation4], 0  ;;  %s15_s11 = sshll.u32 %s178_s0, 4  ;;  %s151_s12 = smov [#allocation2]   ;;  %s16_s11 = int_to_ptr.hbm [resolvable:$true] %s15_s11 }
   0x3   :  { %s17_s13 = sshll.u32 %s151_s12, 4  ;;  %s26_s16 = sshll.u32 %s179_s1, 4  ;;  %s18_s13 = int_to_ptr.vmem [resolvable:$true] %s17_s13  ;;  %s27_s16 = int_to_ptr.hbm [resolvable:$true] %s26_s16 }
   0x4   :  { %20 = dma.hbm_to_vmem [thread:$0]  %s16_s11, 256, %s18_s13, [#allocation3]  }
   0x5   :  { %s152_s17 = smov [#allocation5]  }
   0x6   :  { %s28_s18 = sshll.u32 %s152_s17, 4  ;;  %s29_s18 = int_to_ptr.vmem [resolvable:$true] %s28_s18 }
   0x7   :  { %31 = dma.hbm_to_vmem [thread:$0]  %s27_s16, 256, %s29_s18, [#allocation6]  }
   0x8   :  { %145 = dma.done.wait [#allocation3], 256  }
   0x9   :  { %146 = vsyncadd [#allocation3], 4294967040 }
   0xa   :  { %147 = dma.done.wait [#allocation6], 256  }
   0xb   :  { %148 = vsyncadd [#allocation6], 4294967040  ;;  %v40_v0 = vld [vmem:[#allocation2] sm:$0xff]  ;;  %v44_v1 = vld [vmem:[#allocation5] sm:$0xff]  ;;  %s153_s0 = smov [#allocation7]   ;;  %s59_s21 = sshll.u32 %s180_s2, 4  ;;  %s60_s21 = int_to_ptr.hbm [resolvable:$true] %s59_s21 }
   0xc   :  { %v41_v2 = vld [vmem:[#allocation2 + $0x8] sm:$0xff]  ;;  %v42_v3 = vand.u32 2147483647, %v40_v0  ;;  %v46_v4 = vand.u32 2147483647, %v44_v1  ;;  %v45_v6 = vld [vmem:[#allocation5 + $0x8] sm:$0xff] }
   0xd   :  { %v43_v5 = vand.u32 2147483647, %v41_v2  ;;  %s57_s19 = sshll.u32 %s153_s0, 4  ;;  %v47_v8 = vand.u32 2147483647, %v45_v6  ;;  %s58_s19 = int_to_ptr.vmem [resolvable:$true] %s57_s19 }
   0xe   :  { %v48_v7 = vadd.f32 %v46_v4, %v42_v3 }
   0xf   :  { %v49_v9 = vadd.f32 %v47_v8, %v43_v5 }
  0x10   :  { %50 = vst [vmem:[#allocation7] sm:$0xff] %v48_v7 }
  0x11   :  { %51 = vst [vmem:[#allocation7 + $0x8] sm:$0xff] %v49_v9 }
  0x12   :  { %62 = dma.vmem_to_hbm [thread:$0]  %s58_s19, 256, %s60_s21, [#allocation4]  }
  0x13   :  { %149 = dma.done.wait [#allocation4], 256  }
  0x14   :  { %150 = vsyncadd [#allocation4], 4294967040 }
  0x15   :  { %67 = vsyncpa [#allocation3], 1 }
  0x16   :  { %68 = vsyncpa [#allocation6], 1 }
  0x17   :  { %69 = vsyncpa [#allocation4], 1 }

</bundles_post_ra>
